<compile_context>
chip_gen: v7x
topology: tpu7x:2x2x1
jax: 0.10.0
libtpu: 0.0.40
codegen_flags: <defaults>
</compile_context>

<pallas_src>
import functools

import jax
import jax.numpy as jnp
from jax.experimental import pallas as pl
from jax.experimental.pallas import tpu as pltpu

_LANE = 128
_NEG_INF = -1e30   # padded-class bias -> exp() underflows to exactly 0


def _round_up(x, m):
    return ((x + m - 1) // m) * m


def _cdiv(a, b):
    return (a + b - 1) // b


# ----------------------------------------------------------------------------
# Fused kernel: (x @ w + b) -> softmax -> entropy, D-tiled with f32 accumulator.
# Output tile layout (lane-dense, Kp = multiple of 128):
#   columns [0, K)  : softmax probabilities
#   column  K       : per-row entropy  H = log(s) - sum_j p_j * (l_j - m)
#   columns (K, Kp) : zero padding (bias -1e30 -> p == 0, entropy contrib 0)
# ----------------------------------------------------------------------------
def _fused_model_kernel(x_ref, w_ref, b_ref, out_ref, acc_ref, *, ent_col):
    k = pl.program_id(1)

    @pl.when(k == 0)
    def _init():
        acc_ref[...] = jnp.zeros_like(acc_ref)

    # bf16 cast in-register (x streams from HBM as f32 exactly once), f32 MXU acc.
    acc_ref[...] += jnp.dot(x_ref[...].astype(jnp.bfloat16), w_ref[...],
                            preferred_element_type=jnp.float32)

    @pl.when(k == pl.num_programs(1) - 1)
    def _epilogue():
        logits = acc_ref[...] + b_ref[...]                        # (tb, Kp) f32
        m = jnp.max(logits, axis=-1, keepdims=True)
        z = logits - m
        e = jnp.exp(z)
        s = jnp.sum(e, axis=-1, keepdims=True)
        p = e / s                                                 # exact: rows sum to 1
        # exact entropy via logsumexp; padded columns contribute exactly 0
        h = jnp.log(s) - jnp.sum(p * z, axis=-1, keepdims=True)   # (tb, 1)
        col = jax.lax.broadcasted_iota(jnp.int32, p.shape, 1)
        out_ref[...] = jnp.where(col == ent_col, h, p).astype(out_ref.dtype)


def model_forward_with_entropy(x_flat, w_pad_bf16, b_pad, ent_col, *,
                               block_b=512, out_dtype=jnp.float32):
    """x_flat: (B, D) f32. Returns (B, Kp): probs in [:, :K], entropy in [:, K]."""
    B, D = x_flat.shape
    Kp = w_pad_bf16.shape[1]

    # Batch tile: >=8 rows, capped at block_b, sized so the batch grid has >=2
    # steps when possible (keeps both v7x TensorCores busy).
    tb = int(min(block_b, max(8, _round_up(_cdiv(B, 2), 8))))
    nb = _cdiv(B, tb)

    # Contraction tile: largest of 512/256/128 that divides D, else whole D.
    if D % 512 == 0:
        tk = 512
    elif D % 256 == 0:
        tk = 256
    elif D % 128 == 0:
        tk = 128
    else:
        tk = D
    nk = _cdiv(D, tk)

    # Explicit VMEM budget: double-buffered x / w / bias / out tiles + accumulator.
    out_bytes = jnp.dtype(out_dtype).itemsize
    vmem_est = (2 * tb * tk * 4 + 2 * tk * Kp * 2 + 2 * Kp * 4
                + 2 * tb * Kp * out_bytes + tb * Kp * 4)
    vmem_limit = int(min(64 * 1024 * 1024, vmem_est + 16 * 1024 * 1024))

    return pl.pallas_call(
        functools.partial(_fused_model_kernel, ent_col=ent_col),
        grid=(nb, nk),
        in_specs=[
            pl.BlockSpec((tb, tk), lambda i, k: (i, k)),      # x tile (f32)
            pl.BlockSpec((tk, Kp), lambda i, k: (k, 0)),      # weight tile (bf16)
            pl.BlockSpec((1, Kp), lambda i, k: (0, 0)),       # bias (f32, resident)
        ],
        out_specs=pl.BlockSpec((tb, Kp), lambda i, k: (i, 0)),  # lane-dense output
        out_shape=jax.ShapeDtypeStruct((B, Kp), out_dtype),
        scratch_shapes=[pltpu.VMEM((tb, Kp), jnp.float32)],
        compiler_params=pltpu.CompilerParams(
            dimension_semantics=("parallel", "arbitrary"),
            vmem_limit_bytes=vmem_limit),
    )(x_flat, w_pad_bf16, b_pad)


# ----------------------------------------------------------------------------
# One Tent adaptation step (single jitted executable per call).
# ----------------------------------------------------------------------------
def _tent_step(x, w_pad, b_pad, bn_mean, ref_mean, bn_var, ref_var,
               dis, best_out, is_first, *, num_classes, block_b, out_dtype):
    B = x.shape[0]
    x_flat = x.reshape(B, -1).astype(jnp.float32)

    fused = model_forward_with_entropy(x_flat, w_pad, b_pad, num_classes,
                                       block_b=block_b, out_dtype=out_dtype)
    probs = fused[:, :num_classes].astype(jnp.float32)
    entropy = fused[:, num_classes].astype(jnp.float32)

    # cal_distance: torch.nn.PairwiseDistance(p=2) adds eps=1e-6 to the diff.
    # Tiny [2L, C] reduction, fused into this jit (no separate kernel launch).
    s1 = jnp.concatenate([bn_mean, bn_var], axis=0).astype(jnp.float32)
    s2 = jnp.concatenate([ref_mean, ref_var], axis=0).astype(jnp.float32)
    new_dis = jnp.sum(jnp.sqrt(jnp.sum(jnp.square(s1 - s2 + 1e-6), axis=1)))

    improved = jnp.logical_or(is_first, new_dis < dis)   # device bool, no host sync
    result = jnp.where(improved, probs, best_out)
    dis_out = jnp.where(improved, new_dis, dis)

    # entropy-minimization loss: calc_entropy(outputs).mean()
    loss = jnp.mean(entropy)
    # TODO(synk): loss.backward() + optimizer.step()/zero_grad() (stateful SGD
    # update of the wrapped model) is not reproduced here; loss is only computed.
    return result, dis_out, loss


# ----------------------------------------------------------------------------
# Tent wrapper (state kept as device arrays; no per-step host sync)
# ----------------------------------------------------------------------------
class TentPallas:
    def __init__(self, w, b, bn_means, bn_vars, means_list, vars_list,
                 steps=1, episodic=False, block_b=512, out_dtype=jnp.float32):
        assert steps > 0, "tent requires >= 1 step(s) to forward and update"
        w = jnp.asarray(w, jnp.float32)
        b = jnp.asarray(b, jnp.float32).reshape(1, -1)
        D, K = w.shape
        self.K = K
        # Pad classes to a lane-dense width; reserve one padded lane (col K)
        # for the fused per-row entropy.
        Kp = _round_up(K + 1, _LANE)
        w_pad = jnp.zeros((D, Kp), jnp.float32).at[:, :K].set(w)
        b_pad = jnp.full((1, Kp), _NEG_INF, jnp.float32).at[:, :K].set(b)
        self.w_pad = w_pad.astype(jnp.bfloat16)   # bf16 weights for the MXU
        self.b_pad = b_pad                        # bias stays f32 (post-matmul)

        self.bn_means = bn_means       # dict: domain_id -> [L, C_bn] running means
        self.bn_vars = bn_vars         # dict: domain_id -> [L, C_bn] running vars
        self.means_list = means_list   # dict: domain_id -> [L, C_bn] reference means
        self.vars_list = vars_list     # dict: domain_id -> [L, C_bn] reference vars
        self.steps = steps
        self.episodic = episodic
        self.dis = jnp.asarray(99999999.0, jnp.float32)
        self.best_out = None
        self.loss = None

        self._step = jax.jit(functools.partial(
            _tent_step, num_classes=K, block_b=block_b, out_dtype=out_dtype))

    def forward(self, x, domain_id=None):
        if self.episodic:
            self.reset()
        outputs = None
        for _ in range(self.steps):
            outputs = self.forward_and_adapt(x, domain_id)
        return outputs

    def reset(self):
        self.dis = jnp.asarray(99999999.0, jnp.float32)
        self.best_out = None

    def forward_and_adapt(self, x, domain_id):
        B = x.shape[0]
        if self.best_out is None:
            self.best_out = jnp.zeros((B, self.K), jnp.float32)
            is_first = jnp.asarray(True)
        else:
            is_first = jnp.asarray(False)

        result, new_dis, loss = self._step(
            x, self.w_pad, self.b_pad,
            self.bn_means[domain_id], self.means_list[domain_id],
            self.bn_vars[domain_id], self.vars_list[domain_id],
            self.dis, self.best_out, is_first)

        self.best_out = result
        self.dis = new_dis
        self.loss = loss
        return result


# ----------------------------------------------------------------------------
# Main: deterministic small-shape smoke test + reference checks
# ----------------------------------------------------------------------------
if __name__ == "__main__":
    key = jax.random.PRNGKey(0)
    B, C, H, W = 2, 4, 16, 16       # input x: NCHW
    K = 16                          # num classes
    D = C * H * W
    L, C_BN = 3, 32                 # 3 BN layers, 32 channels each
    DOMAIN_ID = 1

    ks = jax.random.split(key, 8)
    x = jax.random.normal(ks[0], (B, C, H, W), dtype=jnp.float32)
    w = jax.random.normal(ks[1], (D, K), dtype=jnp.float32) * 0.05
    b = jax.random.normal(ks[2], (1, K), dtype=jnp.float32) * 0.01

    bn_means = {DOMAIN_ID: jax.random.normal(ks[3], (L, C_BN), dtype=jnp.float32)}
    bn_vars = {DOMAIN_ID: jax.nn.softplus(jax.random.normal(ks[4], (L, C_BN))).astype(jnp.float32)}
    means_list = {DOMAIN_ID: jax.random.normal(ks[5], (L, C_BN), dtype=jnp.float32)}
    vars_list = {DOMAIN_ID: jax.nn.softplus(jax.random.normal(ks[6], (L, C_BN))).astype(jnp.float32)}

    tent = TentPallas(w, b, bn_means, bn_vars, means_list, vars_list,
                      steps=1, episodic=False)
    out = tent.forward(x, domain_id=DOMAIN_ID)
    out = jax.block_until_ready(out)

    assert out.shape == (B, K)
    # exact softmax divide -> probabilities sum to ~1 per row
    assert bool(jnp.all(jnp.abs(jnp.sum(out, axis=1) - 1.0) < 1e-4))

    # reference: bf16 matmul (f32 accumulate) + f32 softmax, same as kernel path
    x_flat = x.reshape(B, -1)
    ref_logits = jnp.dot(x_flat.astype(jnp.bfloat16), w.astype(jnp.bfloat16),
                         preferred_element_type=jnp.float32) + b
    ref_p = jax.nn.softmax(ref_logits, axis=-1)
    assert bool(jnp.allclose(out, ref_p, atol=2e-3, rtol=2e-3))

    # entropy-minimization loss reference: calc_entropy(outputs).mean()
    ref_ent = -jnp.sum(ref_p * jnp.log(ref_p + 1e-8), axis=1)
    assert bool(jnp.allclose(tent.loss, ref_ent.mean(), atol=2e-3, rtol=2e-3))

    # distance reference (torch.nn.PairwiseDistance semantics: eps on the diff)
    ref_dis = 0.0
    for l in range(L):
        dm = bn_means[DOMAIN_ID][l] - means_list[DOMAIN_ID][l] + 1e-6
        dv = bn_vars[DOMAIN_ID][l] - vars_list[DOMAIN_ID][l] + 1e-6
        ref_dis += jnp.sqrt(jnp.sum(dm * dm)) + jnp.sqrt(jnp.sum(dv * dv))
    assert bool(jnp.allclose(tent.dis, ref_dis, rtol=1e-5, atol=1e-5))

    print("KERNEL_OK")
</pallas_src>

<mosaic_0001>
module attributes {stable_mosaic.version = 11 : i64} {
  func.func @_fused_model_kernel(%arg0: i32, %arg1: i32, %arg2: memref<8x512xf32, #tpu.memory_space<vmem>>, %arg3: memref<512x128xbf16, #tpu.memory_space<vmem>>, %arg4: memref<1x128xf32, #tpu.memory_space<vmem>>, %arg5: memref<8x128xf32, #tpu.memory_space<vmem>>, %arg6: memref<8x128xf32, #tpu.memory_space<vmem>>) attributes {dimension_semantics = [#tpu.dimension_semantics<parallel>, #tpu.dimension_semantics<arbitrary>], iteration_bounds = array<i64: 1, 2>, scalar_prefetch = 0 : i64, scratch_operands = 1 : i64, tpu.core_type = #tpu.core_type<tc>, window_params = [{transform_indices = @transform_0, window_bounds = array<i64: 8, 512>}, {transform_indices = @transform_1, window_bounds = array<i64: 512, 128>}, {pipeline_mode = #tpu.pipeline_mode<synchronous>, transform_indices = @transform_2, window_bounds = array<i64: 1, 128>}, {transform_indices = @transform_3, window_bounds = array<i64: 8, 128>}]} {
    %c0_i32 = arith.constant 0 : i32
    %0 = arith.cmpi eq, %arg1, %c0_i32 : i32
    %1 = arith.extui %0 : i1 to i32
    %c0_i32_0 = arith.constant 0 : i32
    %2 = arith.cmpi ne, %1, %c0_i32_0 : i32
    scf.if %2 {
      %cst_9 = arith.constant 0.000000e+00 : f32
      %13 = vector.broadcast %cst_9 : f32 to vector<8x128xf32>
      %c0_10 = arith.constant 0 : index
      %c0_11 = arith.constant 0 : index
      %14 = vector.load %arg6[%c0_10, %c0_11] : memref<8x128xf32, #tpu.memory_space<vmem>>, vector<8x128xf32>
      tpu.vector_store %arg6[%c0_10, %c0_11], %13 {strides = array<i32>} : memref<8x128xf32, #tpu.memory_space<vmem>>, vector<8x128xf32>,
    } else {
    }
    %c0 = arith.constant 0 : index
    %c0_1 = arith.constant 0 : index
    %3 = vector.load %arg6[%c0, %c0_1] : memref<8x128xf32, #tpu.memory_space<vmem>>, vector<8x128xf32>
    %c0_2 = arith.constant 0 : index
    %c0_3 = arith.constant 0 : index
    %4 = vector.load %arg2[%c0_2, %c0_3] : memref<8x512xf32, #tpu.memory_space<vmem>>, vector<8x512xf32>
    %5 = arith.truncf %4 : vector<8x512xf32> to vector<8x512xbf16>
    %c0_4 = arith.constant 0 : index
    %c0_5 = arith.constant 0 : index
    %6 = vector.load %arg3[%c0_4, %c0_5] : memref<512x128xbf16, #tpu.memory_space<vmem>>, vector<512x128xbf16>
    %cst = arith.constant dense<0.000000e+00> : vector<8x128xf32>
    %7 = tpu.matmul %5, %6, %cst {dimension_numbers = #tpu.dot_dimension_numbers<[1], [0], [0], [1], [0, 0, 1, 1], [], []>} : vector<8x512xbf16>, vector<512x128xbf16>, vector<8x128xf32> -> vector<8x128xf32>
    %8 = arith.addf %3, %7 : vector<8x128xf32>
    %c0_6 = arith.constant 0 : index
    %c0_7 = arith.constant 0 : index
    %9 = vector.load %arg6[%c0_6, %c0_7] : memref<8x128xf32, #tpu.memory_space<vmem>>, vector<8x128xf32>
    tpu.vector_store %arg6[%c0_6, %c0_7], %8 {strides = array<i32>} : memref<8x128xf32, #tpu.memory_space<vmem>>, vector<8x128xf32>,
    %c1_i32 = arith.constant 1 : i32
    %10 = arith.cmpi eq, %arg1, %c1_i32 : i32
    %11 = arith.extui %10 : i1 to i32
    %c0_i32_8 = arith.constant 0 : i32
    %12 = arith.cmpi ne, %11, %c0_i32_8 : i32
    scf.if %12 {
      %c0_9 = arith.constant 0 : index
      %c0_10 = arith.constant 0 : index
      %13 = vector.load %arg6[%c0_9, %c0_10] : memref<8x128xf32, #tpu.memory_space<vmem>>, vector<8x128xf32>
      %c0_11 = arith.constant 0 : index
      %c0_12 = arith.constant 0 : index
      %14 = vector.load %arg4[%c0_11, %c0_12] : memref<1x128xf32, #tpu.memory_space<vmem>>, vector<1x128xf32>
      %15 = vector.broadcast %14 : vector<1x128xf32> to vector<8x128xf32>
      %16 = arith.addf %13, %15 : vector<8x128xf32>
      %cst_13 = arith.constant dense<0xFF800000> : vector<8xf32>
      %17 = vector.multi_reduction <maximumf>, %16, %cst_13 [1] : vector<8x128xf32> to vector<8xf32>
      %18 = vector.shape_cast %17 : vector<8xf32> to vector<8x1xf32>
      %19 = vector.broadcast %18 : vector<8x1xf32> to vector<8x128xf32>
      %20 = arith.subf %16, %19 : vector<8x128xf32>
      %21 = math.exp %20 : vector<8x128xf32>
      %cst_14 = arith.constant dense<0.000000e+00> : vector<8xf32>
      %22 = vector.multi_reduction <add>, %21, %cst_14 [1] : vector<8x128xf32> to vector<8xf32>
      %23 = vector.shape_cast %22 : vector<8xf32> to vector<8x1xf32>
      %24 = vector.broadcast %23 : vector<8x1xf32> to vector<8x128xf32>
      %25 = arith.divf %21, %24 : vector<8x128xf32>
      %26 = math.log %23 : vector<8x1xf32>
      %27 = arith.mulf %25, %20 : vector<8x128xf32>
      %cst_15 = arith.constant dense<0.000000e+00> : vector<8xf32>
      %28 = vector.multi_reduction <add>, %27, %cst_15 [1] : vector<8x128xf32> to vector<8xf32>
      %29 = vector.shape_cast %28 : vector<8xf32> to vector<8x1xf32>
      %30 = arith.subf %26, %29 : vector<8x1xf32>
      %31 = tpu.iota {dimensions = array<i32: 1>} : vector<8x128xi32>
      %c16_i32 = arith.constant 16 : i32
      %32 = vector.broadcast %c16_i32 : i32 to vector<8x128xi32>
      %33 = arith.cmpi eq, %31, %32 : vector<8x128xi32>
      %34 = vector.shape_cast %30 : vector<8x1xf32> to vector<8x1xf32>
      %35 = vector.broadcast %34 : vector<8x1xf32> to vector<8x128xf32>
      %36 = arith.select %33, %35, %25 : vector<8x128xi1>, vector<8x128xf32>
      %c0_16 = arith.constant 0 : index
      %c0_17 = arith.constant 0 : index
      %37 = vector.load %arg5[%c0_16, %c0_17] : memref<8x128xf32, #tpu.memory_space<vmem>>, vector<8x128xf32>
      tpu.vector_store %arg5[%c0_16, %c0_17], %36 {strides = array<i32>} : memref<8x128xf32, #tpu.memory_space<vmem>>, vector<8x128xf32>,
    } else {
    }
    return
  }
  func.func @transform_0(%arg0: i32, %arg1: i32) -> (i32, i32) {
    %c0_i32 = arith.constant 0 : i32
    return %arg0, %arg1 : i32, i32
  }
  func.func @transform_1(%arg0: i32, %arg1: i32) -> (i32, i32) {
    %c0_i32 = arith.constant 0 : i32
    %c0_i32_0 = arith.constant 0 : i32
    return %arg1, %c0_i32 : i32, i32
  }
  func.func @transform_2(%arg0: i32, %arg1: i32) -> (i32, i32) {
    %c0_i32 = arith.constant 0 : i32
    %c0_i32_0 = arith.constant 0 : i32
    %c0_i32_1 = arith.constant 0 : i32
    return %c0_i32, %c0_i32_0 : i32, i32
  }
  func.func @transform_3(%arg0: i32, %arg1: i32) -> (i32, i32) {
    %c0_i32 = arith.constant 0 : i32
    %c0_i32_0 = arith.constant 0 : i32
    return %arg0, %c0_i32 : i32, i32
  }
}

</mosaic_0001>

<bundles_post_ra>
// kernel: _tent_step.1
= control target key start
LH: loop header
LB: loop body
LE: loop exit
PB: predicated region body
PF: predicated region fallthrough
CT: control target
= control target key end

     0   :  { %8 = vsyncpa [#allocation5], 0  ;;  %s1461_s0 = inlined_call_operand.vmem [shape: f32[2,1024], index: 0, kind: input, shape index: {}]   ;;  %s1462_s1 = inlined_call_operand.hbm [shape: bf16[1024,128], index: 1, kind: input, shape index: {}]   ;;  %s1463_s2 = inlined_call_operand.vmem [shape: f32[1,128], index: 2, kind: input, shape index: {}]   ;;  %s1464_s3 = inlined_call_operand.vmem [shape: f32[2,128], index: 3, kind: output, shape index: {}]  }
   0x1   :  { %10 = vsyncpa [#allocation5 + $0x1], 0  ;;  %s1291_s12 = smov 0   ;;  %s1293_s13 = smov 0  }
   0x2   :  { %s1295_s14 = smov 0   ;;  %s1297_s15 = smov 0  }
   0x3   :  { %s1299_s16 = smov 0   ;;  %s1301_s17 = smov 0  }
   0x4 LB: > { %s884_s18 = sadd.s32 4294967295, %s1256_s17   ;;  %s25_s19 = sadd.s32 1, %s1252_s16  ;;  %s1256_s17 = sphi %s1301_s17, %s16_s17   ;;  %s1252_s16 = sphi %s1299_s16, %s1471_s16   ;;  %s1248_s15 = sphi %s1297_s15, %s1470_s15   ;;  %s1244_s14 = sphi %s1295_s14, %s1469_s14   ;;  %s1240_s13 = sphi %s1293_s13, %s1468_s13   ;;  %s1236_s12 = sphi %s1291_s12, %s1467_s12  }
   0x5   : > { %p26_p0 = scmp.ge.s32.totalorder %s25_s19, 2  ;;  %s37_s20 = sadd.s32 1, %s1244_s14 }
   0x6   : > { %p44_p1 = scmp.ne.s32.totalorder %s1244_s14, %s1240_s13  ;;  %p45_p2 = scmp.eq.s32.totalorder %s1256_s17, 0 }
   0x7   : > { %s1473_s19 = smov (%p26_p0, %s25_s19), 0  ;;  %p76_p4 = scmp.ne.s32.totalorder %s1240_s13, %s1236_s12 }
   0x8   : > { %p1327_p3 = por %p45_p2, %p44_p1  ;;  %s33_s22 = ssub.s32 %s1252_s16, %s1473_s19 }
   0x9   : > { %p77_p5 = scmp.eq.s32.totalorder %s884_s18, 0  ;;  %p35_p6 = scmp.eq.s32.totalorder %s33_s22, 0 }
   0xa   : > { %p886_p8 = scmp.ge.s32.totalorder %s1256_s17, 2 }
   0xb   : > { %p1336_p7 = por %p77_p5, %p76_p4 }
   0xc   : > { %s1341_s24 = scalar_select %p35_p6, %s1244_s14, %s37_s20  }
   0xd   : > { %146 = sbr.rel (%p886_p8) target bundleno = 63 (0x3f), region = 20 }
  0x14   : > { %149 = sbr.rel (!%p1327_p3) target bundleno = 37 (0x25), region = 24  ;;  %s151_s25 = sand.u32 (%p1327_p3), 1, %s1244_s14  }
  0x15   : > { %s938_s26 = sshll.u32 (%p1327_p3), %s1252_s16, 3  ;;  %s887_s27 = sshll.u32 (%p1327_p3), %s151_s25, 5 }
  0x16   : > { %s163_s30 = scalar_lea.vmem (%p1327_p3), %s1461_s0, %s938_s26   ;;  %s153_s4 = scalar_lea.vmem (%p1327_p3), [#allocation3], %s887_s27  }
  0x17   : > { %s1258_s5 = smov (%p1327_p3), 0  }
  0x1b LB: >> { %v201_v0 = vld [vmem:[%s163_s30] sm:$0xff]  ;;  %s195_s5 = sadd.s32 1, %s1260_s5   ;;  %s1260_s5 = sphi %s1258_s5, %s195_s5  }
  0x1c   : >> { %202 = vst [vmem:[%s153_s4] sm:$0xff] %v201_v0  ;;  %p194_p9 = scmp.ge.s32.totalorder %s195_s5, 1 }
  0x1e   : > { %197 = sbr.rel (!%p194_p9) target bundleno = 27 (0x1b), region = 157 }
  0x25 PF: > { %s216_s6 = sand.u32 1, %s1244_s14   ;;  %s939_s7 = sshll.u32 %s1252_s16, 12 }
  0x26   : > { %s892_s8 = sshll.u32 %s216_s6, 8  ;;  %s1356_s11 = scalar_lea.hbm %s1462_s1, %s939_s7 }
  0x27   : > { %s220_s12 = scalar_lea.vmem [#allocation4], %s892_s8  ;;  %s1360_s22 = scalar_lea.sflag [#allocation5], %s216_s6 }
  0x28   : > { %s227_s20 = sshll.u32 %s220_s12, 4  ;;  %s1146_s25 = scalar_lea.hbm %s1356_s11, 4096  ;;  %s1358_s20 = int_to_ptr.vmem [resolvable:$true] %s227_s20 }
  0x29   : > { %p1147_p10 = scmp.ne.s32.totalorder %s1356_s11, %s1146_s25  ;;  %s1150_s28 = scalar_lea.hbm %s1462_s1, 8192 }
  0x2a   : > { %p1151_p13 = scmp.lt.u32.totalorder %s1356_s11, %s1462_s1  ;;  %p1152_p0 = scmp.lt.u32.totalorder %s1150_s28, %s1146_s25 }
  0x2b   : > { %p1148_p11 = pnand %p1147_p10, %p1327_p3  ;;  %p1154_p2 = scmp.lt.u32.totalorder %s1146_s25, %s1356_s11 }
  0x2c   : > { %p1153_p1 = por %p1152_p0, %p1151_p13 }
  0x2d   : > { %p1149_p12 = pneg %p1148_p11 }
  0x2e   : > { %p1155_p4 = por %p1154_p2, %p1153_p1 }
  0x30   : > { %p1156_p5 = pnand %p1155_p4, %p1149_p12 }
  0x32   : > { %1159 = shalt.err (!%p1156_p5)
}
  0x33   : > { %s1160_s4 = scalar_lea.vmem %s1358_s20, 4096  ;;  %s1266_s5 = smov [#allocation4]  }
  0x34   : > { %p1161_p6 = scmp.ne.s32.totalorder %s1358_s20, %s1160_s4  ;;  %s1164_s6 = sshll.u32 %s1266_s5, 4  ;;  %s1165_s6 = int_to_ptr.vmem [resolvable:$false] %s1164_s6 }
  0x35   : > { %s1166_s7 = scalar_lea.vmem %s1165_s6, 8192  ;;  %p1167_p10 = scmp.lt.s32.totalorder %s1358_s20, %s1165_s6 }
  0x36   : > { %p1162_p8 = pnand %p1161_p6, %p1327_p3  ;;  %p1168_p11 = scmp.lt.s32.totalorder %s1166_s7, %s1160_s4 }
  0x38   : > { %p1163_p9 = pneg %p1162_p8  ;;  %p1169_p13 = por %p1168_p11, %p1167_p10 }
  0x3a   : > { %p1170_p0 = pnand %p1169_p13, %p1163_p9 }
  0x3c   : > { %1173 = shalt.err (!%p1170_p0)
}
  0x3d   : > { %s1267_s8 = smov 64   ;;  %s1268_s9 = smov 4  }
  0x3e   : > { %984 = dma.hbm_to_vmem [thread:$0]  (%p1327_p3), %s1356_s11, 4096, %s1358_s20, %s1360_s22, %s1267_s8, %s1267_s8, %s1268_s9  }
  0x3f PF: > { %p895_p12 = scmp.ge.s32.totalorder %s1256_s17, 1  ;;  %p235_p1 = scmp.lt.s32.totalorder %s1256_s17, 3 }
  0x41   : > { %p236_p2 = pnand %p895_p12, %p235_p1 }
  0x42   : > { %s242_s10 = sand.u32 (!%p236_p2), 1, %s1240_s13  }
  0x43   : > { %239 = sbr.rel (%p236_p2) target bundleno = 827 (0x33b), region = 66  ;;  %s896_s12 = sshll.u32 (!%p236_p2), %s242_s10, 5 }
  0x44   : > { %s897_s25 = sshll.u32 (!%p236_p2), %s242_s10, 8  ;;  %s1387_s26 = scalar_lea.vmem (!%p236_p2), [#allocation3], %s896_s12 }
  0x45   : > { %s249_s27 = scalar_lea.sflag (!%p236_p2), [#allocation5], %s242_s10  ;;  %s1389_s28 = scalar_lea.vmem (!%p236_p2), [#allocation4], %s897_s25 }
  0x4a   : > { %1231 = dma.done.wait (%p1336_p7), %s249_s27, 4096  }
  0x4b   : > { %1233 = vsyncadd (%p1336_p7), %s249_s27, 4294963200  ;;  %p898_p3 = scmp.ne.s32.totalorder %s1248_s15, 0 }
  0x4c   : > { %v1269_v1 = vmov (!%p898_p3), 0.0  }
  0x4d   : > { %287 = sbr.rel (%p898_p3) target bundleno = 84 (0x54), region = 78  ;;  %288 = vst [vmem:[#allocation2] sm:$0xff] (!%p898_p3), %v1269_v1 }
  0x54 PF: > { %v1102_v2 = vld [vmem:[%s1389_s28 + $0x40] sm:$0xff]   ;;  %v1106_v6 = vld [vmem:[%s1389_s28 + $0x48] sm:$0xff]   ;;  %v1110_v10 = vld [vmem:[%s1389_s28 + $0x50] sm:$0xff]   ;;  %v305_v32 = vlaneseq  ;;  %v1270_v35 = vmov 1983009808   ;;  %p931_p7 = scmp.ne.s32.totalorder %s1248_s15, 1 }
  0x55   : > { %v1103_v3 = vld [vmem:[%s1389_s28 + $0xc0] sm:$0xff]   ;;  %940 = vmatprep.subr.bf16.mxu0 %v1102_v2  ;;  %v1107_v7 = vld [vmem:[%s1389_s28 + $0xc8] sm:$0xff]   ;;  %v1111_v11 = vld [vmem:[%s1389_s28 + $0xd0] sm:$0xff]   ;;  %v303_v36 = vunpack.c.l.s4 %v1270_v35 }
  0x56   : > { %v1104_v4 = vld [vmem:[%s1389_s28] sm:$0xff]   ;;  %962 = vmatprep.subr.bf16.mxu1 %v1103_v3  ;;  %v1108_v8 = vld [vmem:[%s1389_s28 + $0x8] sm:$0xff]   ;;  %v1112_v12 = vld [vmem:[%s1389_s28 + $0x10] sm:$0xff]   ;;  %v306_v37 = vshrl.u32 %v305_v32, 7 }
  0x57   : > { %v1105_v5 = vld [vmem:[%s1389_s28 + $0x80] sm:$0xff]   ;;  %941 = vmatpush3.bf16.msra.mxu0 %v1104_v4  ;;  %v1109_v9 = vld [vmem:[%s1389_s28 + $0x88] sm:$0xff]   ;;  %v1113_v13 = vld [vmem:[%s1389_s28 + $0x90] sm:$0xff]   ;;  %v304_v40 = vunpack.c.0.s8 %v303_v36 }
  0x58   : > { %963 = vmatpush3.bf16.msra.mxu1 %v1105_v5  ;;  %942 = vmatprep.subr.bf16.mxu0 %v1106_v6  ;;  %v1114_v14 = vld [vmem:[%s1389_s28 + $0x58] sm:$0xff]   ;;  %v1118_v18 = vld [vmem:[%s1389_s28 + $0x60] sm:$0xff]   ;;  %v1122_v22 = vld [vmem:[%s1389_s28 + $0x68] sm:$0xff]  }
  0x59   : > { %964 = vmatprep.subr.bf16.mxu1 %v1107_v7  ;;  %v1115_v15 = vld [vmem:[%s1389_s28 + $0xd8] sm:$0xff]   ;;  %v1119_v19 = vld [vmem:[%s1389_s28 + $0xe0] sm:$0xff]   ;;  %v1123_v23 = vld [vmem:[%s1389_s28 + $0xe8] sm:$0xff]   ;;  %v307_v43 = vsub.s32 %v304_v40, %v306_v37 }
  0x5a   : > { %v1116_v16 = vld [vmem:[%s1389_s28 + $0x18] sm:$0xff]   ;;  %v1120_v20 = vld [vmem:[%s1389_s28 + $0x20] sm:$0xff]   ;;  %v1124_v24 = vld [vmem:[%s1389_s28 + $0x28] sm:$0xff]  }
  0x5b   : > { %943 = vmatpush3.bf16.msra.mxu0 %v1108_v8  ;;  %v1117_v17 = vld [vmem:[%s1389_s28 + $0x98] sm:$0xff]   ;;  %v1121_v21 = vld [vmem:[%s1389_s28 + $0xa0] sm:$0xff]   ;;  %v1125_v25 = vld [vmem:[%s1389_s28 + $0xa8] sm:$0xff]  }
  0x5c   : > { %965 = vmatpush3.bf16.msra.mxu1 %v1109_v9  ;;  %944 = vmatprep.subr.bf16.mxu0 %v1110_v10  ;;  %v1126_v26 = vld [vmem:[%s1389_s28 + $0x70] sm:$0xff]   ;;  %v1130_v30 = vld [vmem:[%s1389_s28 + $0x78] sm:$0xff]   ;;  %v1134_v38 = vld [vmem:[%s1387_s26] ss:$8 sps:$4 sm:$0xff]  }
  0x5d   : > { %966 = vmatprep.subr.bf16.mxu1 %v1111_v11  ;;  %v1127_v27 = vld [vmem:[%s1389_s28 + $0xf0] sm:$0xff]   ;;  %v1131_v31 = vld [vmem:[%s1389_s28 + $0xf8] sm:$0xff]   ;;  %v1138_v41 = vld [vmem:[%s1387_s26 + $0x4] ss:$8 sps:$4 sm:$0xff]   ;;  %v308_v44 = vrot.slane %v1134_v38, %v307_v43 }
  0x5e   : > { %v1128_v28 = vld [vmem:[%s1389_s28 + $0x30] sm:$0xff]   ;;  %v1132_v33 = vld [vmem:[%s1389_s28 + $0x38] sm:$0xff]   ;;  %v315_v46 = vrot.slane %v1138_v41, %v307_v43 }
  0x5f   : > { %945 = vmatpush3.bf16.msra.mxu0 %v1112_v12  ;;  %v1129_v29 = vld [vmem:[%s1389_s28 + $0xb0] sm:$0xff]   ;;  %v1133_v34 = vld [vmem:[%s1389_s28 + $0xb8] sm:$0xff]  }
  0x60   : > { %967 = vmatpush3.bf16.msra.mxu1 %v1113_v13  ;;  %946 = vmatprep.subr.bf16.mxu0 %v1114_v14  ;;  %v1136_v39 = vld [vmem:[%s1387_s26 + $0x10] ss:$8 sps:$4 sm:$0xff]   ;;  %v1139_v42 = vld [vmem:[%s1387_s26 + $0x14] ss:$8 sps:$4 sm:$0xff]  }
  0x61   : > { %968 = vmatprep.subr.bf16.mxu1 %v1115_v15  ;;  %v322_v45 = vrot.slane %v1136_v39, %v307_v43  ;;  %v329_v47 = vrot.slane %v1139_v42, %v307_v43  ;;  %v289_v0 = vld [vmem:[#allocation2] sm:$0xff] }
  0x62   : > { %v932_v6 = vld [vmem:[%s1463_s2] ss:$0 sm:$0xff] (!%p931_p7) }
  0x63   : > { %947 = vmatpush3.bf16.msra.mxu0 %v1116_v16  ;;  %v331_v48 = vcombine.high %v308_v44, %v322_v45  ;;  %v333_v49 = vcombine.high %v315_v46, %v329_v47  ;;  %v330_v50 = vcombine.low %v308_v44, %v322_v45  ;;  %v332_v51 = vcombine.low %v315_v46, %v329_v47 }
  0x64   : > { %969 = vmatpush3.bf16.msra.mxu1 %v1117_v17  ;;  %948 = vmatprep.subr.bf16.mxu0 %v1118_v18  ;;  %v709_v17 = vand.u32 (!%p931_p7), 127, %v305_v32 }
  0x65   : > { %970 = vmatprep.subr.bf16.mxu1 %v1119_v19  ;;  %v339_v52 = vpack.c.bf16 %v331_v48, %v331_v48  ;;  %v341_v53 = vpack.c.bf16 %v333_v49, %v333_v49  ;;  %v338_v54 = vpack.c.bf16 %v330_v50, %v330_v50  ;;  %v340_v55 = vpack.c.bf16 %v332_v51, %v332_v51 }
  0x66   : > { %vm710_vm0 = vcmp.eq.s32.totalorder (!%p931_p7), %v709_v17, 16 }
  0x67   : > { %949 = vmatpush3.bf16.msra.mxu0 %v1120_v20  ;;  %630 = vmatprep.mubr.bf16.mxu0 %v339_v52 }
  0x68   : > { %971 = vmatpush3.bf16.msra.mxu1 %v1121_v21  ;;  %950 = vmatprep.subr.bf16.mxu0 %v1122_v22 }
  0x69   : > { %972 = vmatprep.subr.bf16.mxu1 %v1123_v23  ;;  %670 = vmatprep.mubr.bf16.mxu1 %v341_v53 }
  0x6b   : > { %951 = vmatpush3.bf16.msra.mxu0 %v1124_v24 }
  0x6c   : > { %973 = vmatpush3.bf16.msra.mxu1 %v1125_v25  ;;  %952 = vmatprep.subr.bf16.mxu0 %v1126_v26 }
  0x6d   : > { %974 = vmatprep.subr.bf16.mxu1 %v1127_v27 }
  0x6f   : > { %953 = vmatpush3.bf16.msra.mxu0 %v1128_v28 }
  0x70   : > { %975 = vmatpush3.bf16.msra.mxu1 %v1129_v29  ;;  %954 = vmatprep.subr.bf16.mxu0 %v1130_v30 }
  0x71   : > { %976 = vmatprep.subr.bf16.mxu1 %v1131_v31 }
  0x73   : > { %955 = vmatpush3.bf16.msra.mxu0 %v1132_v33 }
  0x74   : > { %977 = vmatpush3.bf16.msra.mxu1 %v1133_v34 }
  0x76   : > { %631 = vmatmul.mubr.bf16.vlgmr.msra.gmra.mrb[0].mxu0 %v338_v54 }
  0x77   : > { %671 = vmatmul.mubr.bf16.vlgmr.msra.gmra.mrb[0].mxu1 %v340_v55 }
 0x149   : > { %v956_v56 = vpop.f32.mrb[0].mxu0 }
 0x14a   : > { %v978_v57 = vpop.f32.mrb[0].mxu1  ;;  %v957_v58 = vpop.f32.mrb[1].mxu0 }
 0x14b   : > { %v979_v59 = vpop.f32.mrb[1].mxu1  ;;  %v958_v60 = vadd.f32 %v957_v58, %v956_v56  ;;  %v959_v62 = vpop.f32.mrb[2].mxu0 }
 0x14c   : > { %v980_v61 = vadd.f32 %v979_v59, %v978_v57  ;;  %v981_v63 = vpop.f32.mrb[2].mxu1  ;;  %v960_v1 = vpop.f32.mrb[3].mxu0  ;;  %683 = sbr.rel (%p931_p7) target bundleno = 808 (0x328), region = 82 }
 0x14d   : > { %v982_v2 = vpop.f32.mrb[3].mxu1 }
 0x14e   : > { %v673_v3 = vadd.f32 %v980_v61, %v958_v60 }
 0x150   : > { %v678_v4 = vadd.f32 %v673_v3, %v289_v0 }
 0x152   : > { %679 = vst [vmem:[#allocation2] sm:$0xff] %v678_v4 }
 0x159   : > { %v684_v5 = vld [vmem:[#allocation2] sm:$0xff] }
 0x15a   : > { %v692_v7 = vadd.f32 %v932_v6, %v684_v5 }
 0x15c   : > { %693 = vmax.xlane.f32.xlu0 %v692_v7 }
 0x1e9   : > { %v694_v8 = vpop.xlane.xlu0 %693 }
 0x1ea   : > { %v695_v9 = vsub.f32 %v692_v7, %v694_v8 }
 0x1ec   : > { %v696_v10 = vmul.f32 1.442695, %v695_v9 }
 0x1ee   : > { %1140 = vpow2.f32 %v696_v10 }
 0x1f8   : > { %v1141_v11 = vpop.eup %1140 }
 0x1f9   : > { %698 = vadd.xlane.f32.xlu0 %v1141_v11 }
 0x286   : > { %v699_v12 = vpop.xlane.xlu0 %698 }
 0x287   : > { %1142 = vrcp.f32 %v699_v12 }
 0x288   : > { %1144 = vlog2.f32 %v699_v12 }
 0x291   : > { %v1143_v13 = vpop.eup %1142 }
 0x292   : > { %v701_v14 = vmul.f32 %v1143_v13, %v1141_v11  ;;  %v1145_v16 = vpop.eup %1144 }
 0x293   : > { %v703_v18 = vmul.f32 0.6931472, %v1145_v16 }
 0x294   : > { %v704_v15 = vmul.f32 %v701_v14, %v695_v9 }
 0x296   : > { %705 = vadd.xlane.f32.xlu1 %v704_v15 }
 0x323   : > { %v706_v19 = vpop.xlane.xlu1 %705 }
 0x324   : > { %v707_v20 = vsub.f32 %v703_v18, %v706_v19 }
 0x326   : > { %v711_v21 = vsel %vm710_vm0, %v707_v20, %v701_v14 }
 0x327   : > { %712 = vst [vmem:[#allocation6] sm:$0xff] %v711_v21 }
 0x328 PF: > { %p933_p4 = scmp.ne.s32.totalorder %s884_s18, 1 }
 0x329   : > { %s1262_s15 = smov (!%p933_p4), 0  }
 0x32a   : > { %715 = sbr.rel (%p933_p4) target bundleno = 827 (0x33b), region = 86 }
 0x331 LB: >> { %v739_v22 = vld [vmem:[#allocation6] sm:$0x3]  ;;  %s733_s15 = sadd.s32 1, %s1264_s15   ;;  %s1264_s15 = sphi %s1262_s15, %s733_s15  }
 0x332   : >> { %740 = vst [vmem:[%s1464_s3] sm:$0x3] %v739_v22  ;;  %p732_p5 = scmp.ge.s32.totalorder %s733_s15, 1 }
 0x334   : > { %735 = sbr.rel (!%p732_p5) target bundleno = 817 (0x331), region = 168 }
 0x33b PF: > { %s16_s17 = sadd.s32 1, %s1256_s17   ;;  %s1467_s12 = smov %s1240_s13 }
 0x33c   : > { %p13_p6 = scmp.ge.s32.totalorder %s16_s17, 4   ;;  %s1468_s13 = smov %s1244_s14 }
 0x33d   : > { %s1469_s14 = smov %s1341_s24  ;;  %s1470_s15 = smov %s1252_s16 }
 0x33e   : > { %s1471_s16 = smov %s1473_s19  ;;  %15 = sbr.rel (!%p13_p6) target bundleno = 4 (0x4), region = 179 }
 0x345   :  { %778 = vsyncpa [#allocation5], 1 }
 0x346   :  { %780 = vsyncpa [#allocation5 + $0x1], 1 }

</bundles_post_ra>
